<compile_context>
chip_gen: v6e
topology: v6e:2x2x1
jax: 0.10.0
libtpu: 0.0.40
codegen_flags: <defaults>
</compile_context>

<pallas_src>
import functools

import jax
import jax.numpy as jnp
import numpy as np
from jax.experimental import pallas as pl
from jax.experimental.pallas import tpu as pltpu


def _round_up(x, m):
    return ((x + m - 1) // m) * m


@functools.lru_cache(maxsize=None)
def _vmem_budget_bytes():
    """~75% of per-core VMEM (headroom for Mosaic internal scratch)."""
    try:
        cap = int(pltpu.get_tpu_info().vmem_capacity_bytes)
    except Exception:
        cap = 64 * 1024 * 1024          # conservative fallback (v7x per-TC size)
    return cap * 3 // 4


def _compiler_params(*pipeline_buffer_bytes):
    need = 2 * int(sum(pipeline_buffer_bytes))          # double-buffered streams
    budget = _vmem_budget_bytes()
    limit = int(min(max(need + need // 2, 32 * 1024 * 1024), budget))
    return pltpu.CompilerParams(dimension_semantics=("parallel",),
                                vmem_limit_bytes=limit)


# ----------------------------- Pallas kernels --------------------------------
def _matmul_stats_kernel(p_ref, w_ref, y_ref, sum_ref, sq_ref):
    """BN path, pass 1: y = P @ W (f32 accumulate), store y (bf16/f32) plus
    per-tile per-column (sum, sum-of-squares) partials from the f32 values."""
    y = jnp.dot(p_ref[...], w_ref[...], preferred_element_type=jnp.float32)
    y_ref[...] = y.astype(y_ref.dtype)
    sum_ref[...] = jnp.sum(y, axis=0, keepdims=True).reshape(sum_ref.shape)
    sq_ref[...] = jnp.sum(y * y, axis=0, keepdims=True).reshape(sq_ref.shape)


def _bn_relu_kernel(y_ref, scale_ref, shift_ref, o_ref):
    """BN path, pass 2: fused y*scale + shift -> ReLU (per-column scale/shift)."""
    y = y_ref[...].astype(jnp.float32)
    o_ref[...] = jnp.maximum(y * scale_ref[...] + shift_ref[...],
                             0.0).astype(o_ref.dtype)


def _matmul_tanh_kernel(p_ref, w_ref, b_ref, o_ref):
    """Last block: y = P @ W + b -> tanh (single pass)."""
    y = jnp.dot(p_ref[...], w_ref[...], preferred_element_type=jnp.float32)
    o_ref[...] = jnp.tanh(y + b_ref[...]).astype(o_ref.dtype)


# ------------------------------ JAX wrapper ----------------------------------
@functools.partial(jax.jit,
                   static_argnames=("stride", "is_last_block", "matmul_dtype",
                                    "row_tile"))
def gen_block(x_nchw, w_t, bias, gamma, beta, *, stride=2, is_last_block=False,
              matmul_dtype=jnp.bfloat16, row_tile=512):
    """GenBlock forward.

    x_nchw: (N, Cin, H, W); w_t: PyTorch ConvTranspose2d weight (Cin, Cout, 3, 3).
    Returns NCHW float32 (matching the PyTorch module).
    """
    N, Cin, H, W = x_nchw.shape
    _, Cout, k, k2 = w_t.shape
    assert k == 3 and k2 == 3 and stride == 2, "sub-pixel path assumes k=3, s=2"

    Ho, Wo = 2 * H + 1, 2 * W + 1
    Hg, Wg = H + 1, W + 1                 # common sub-pixel grid (1 row/col halo)
    R = N * Hg * Wg                       # matmul rows (4x fewer than N*Ho*Wo)
    K = 4 * Cin                           # 2x2 input taps per grid point
    C_tot = 4 * Cout                      # 4 parity groups stacked on lanes

    isz = jnp.dtype(matmul_dtype).itemsize
    store_dtype = matmul_dtype            # y / activations stored at this dtype
    ssz = jnp.dtype(store_dtype).itemsize

    K_pad = _round_up(K, 128)
    C_pad = _round_up(C_tot, 128)
    budget = _vmem_budget_bytes()

    # Pass-1 row tile: shrink until double-buffered working set fits comfortably.
    TM1 = min(_round_up(row_tile, 8), _round_up(R, 8))

    def _need(tm):
        return (2 * tm * K_pad * isz + 2 * K_pad * C_pad * isz
                + 2 * tm * C_pad * max(ssz, 4))

    while TM1 > 64 and _need(TM1) > budget // 2:
        TM1 = max(64, _round_up(TM1 // 2, 8))

    # Pass-2 (pure mem-bound) uses a larger tile for HBM-roofline-sized blocks.
    f = min(8, max(1, -(-R // TM1)))
    while f > 1 and 4 * TM1 * f * C_pad * ssz > budget // 2:
        f -= 1
    TM2 = TM1 * f
    R_pad = _round_up(R, TM2)
    n1 = R_pad // TM1
    n2 = R_pad // TM2

    # --- glue: 2x2-tap gather of x, built directly into a channel-padded buffer
    # P[(n,r,c), (a,b,ci)] = x[n, r-a, c-b, ci]  (zero outside [0,H)x[0,W)).
    x = jnp.transpose(x_nchw, (0, 2, 3, 1)).astype(matmul_dtype)          # NHWC
    P4 = jnp.zeros((N, Hg, Wg, K_pad), matmul_dtype)
    for a in (0, 1):
        for b in (0, 1):
            t = 2 * a + b
            P4 = P4.at[:, a:a + H, b:b + W, t * Cin:(t + 1) * Cin].set(x)
    P = P4.reshape(R, K_pad)
    if R_pad != R:
        P = jnp.pad(P, ((0, R_pad - R), (0, 0)))

    # Group-stacked weight: column block g feeds output parity
    # (oh%2, ow%2) = (g//2, g%2); structural zeros elsewhere.
    w = w_t.astype(jnp.float32)                                   # (Cin,Cout,3,3)
    Wg4 = jnp.zeros((2, 2, Cin, 4, Cout), jnp.float32)            # [a,b,ci,g,co]
    for a in (0, 1):
        for b in (0, 1):
            Wg4 = Wg4.at[a, b, :, 0, :].set(w[:, :, 2 * a, 2 * b])  # (even, even)
    for a in (0, 1):
        Wg4 = Wg4.at[a, 0, :, 1, :].set(w[:, :, 2 * a, 1])          # (even, odd)
    for b in (0, 1):
        Wg4 = Wg4.at[0, b, :, 2, :].set(w[:, :, 1, 2 * b])          # (odd, even)
    Wg4 = Wg4.at[0, 0, :, 3, :].set(w[:, :, 1, 1])                  # (odd, odd)
    Wm = jnp.pad(Wg4.reshape(K, C_tot).astype(matmul_dtype),
                 ((0, K_pad - K), (0, C_pad - C_tot)))

    p_spec = pl.BlockSpec((TM1, K_pad), lambda i: (i, 0))
    w_spec = pl.BlockSpec((K_pad, C_pad), lambda i: (0, 0))         # resident
    y1_spec = pl.BlockSpec((TM1, C_pad), lambda i: (i, 0))
    y2_spec = pl.BlockSpec((TM2, C_pad), lambda i: (i, 0))
    chan_spec = pl.BlockSpec((1, C_pad), lambda i: (0, 0))          # resident
    stat_spec = pl.BlockSpec((1, 1, C_pad), lambda i: (i, 0, 0))

    if is_last_block:
        b_pack = jnp.pad(jnp.tile(bias.astype(jnp.float32), 4),
                         (0, C_pad - C_tot)).reshape(1, C_pad)
        out_flat = pl.pallas_call(
            _matmul_tanh_kernel,
            out_shape=jax.ShapeDtypeStruct((R_pad, C_pad), store_dtype),
            grid_spec=pltpu.PrefetchScalarGridSpec(
                num_scalar_prefetch=0, grid=(n1,),
                in_specs=[p_spec, w_spec, chan_spec],
                out_specs=y1_spec),
            compiler_params=_compiler_params(TM1 * K_pad * isz,
                                             K_pad * C_pad * isz,
                                             C_pad * 4, TM1 * C_pad * ssz),
            cost_estimate=pl.CostEstimate(
                flops=2 * R_pad * K_pad * C_pad,
                transcendentals=R_pad * C_pad,
                bytes_accessed=R_pad * K_pad * isz + K_pad * C_pad * isz
                               + C_pad * 4 + R_pad * C_pad * ssz),
        )(P, Wm, b_pack)
    else:
        # Conv bias is exactly cancelled by the BN mean subtraction -> skipped.
        y, psum, psq = pl.pallas_call(
            _matmul_stats_kernel,
            out_shape=(jax.ShapeDtypeStruct((R_pad, C_pad), store_dtype),
                       jax.ShapeDtypeStruct((n1, 1, C_pad), jnp.float32),
                       jax.ShapeDtypeStruct((n1, 1, C_pad), jnp.float32)),
            grid_spec=pltpu.PrefetchScalarGridSpec(
                num_scalar_prefetch=0, grid=(n1,),
                in_specs=[p_spec, w_spec],
                out_specs=(y1_spec, stat_spec, stat_spec)),
            compiler_params=_compiler_params(TM1 * K_pad * isz,
                                             K_pad * C_pad * isz,
                                             TM1 * C_pad * ssz, 2 * C_pad * 4),
            cost_estimate=pl.CostEstimate(
                flops=2 * R_pad * K_pad * C_pad,
                transcendentals=0,
                bytes_accessed=R_pad * K_pad * isz + K_pad * C_pad * isz
                               + R_pad * C_pad * ssz + 2 * n1 * C_pad * 4),
        )(P, Wm)

        # Global batch statistics.  Padded rows/columns and structurally invalid
        # parity positions are exact zeros, so they contribute nothing; divide
        # by the true output-pixel count N*Ho*Wo.
        n_valid = N * Ho * Wo
        col_sum = jnp.sum(psum[:, 0, :], axis=0)[:C_tot].reshape(4, Cout)
        col_sq = jnp.sum(psq[:, 0, :], axis=0)[:C_tot].reshape(4, Cout)
        mean = jnp.sum(col_sum, axis=0) / n_valid
        var = jnp.maximum(jnp.sum(col_sq, axis=0) / n_valid - mean * mean, 0.0)
        scale = gamma.astype(jnp.float32) * jax.lax.rsqrt(var + 1e-5)
        shift = beta.astype(jnp.float32) - mean * scale
        scale_p = jnp.pad(jnp.tile(scale, 4), (0, C_pad - C_tot)).reshape(1, C_pad)
        shift_p = jnp.pad(jnp.tile(shift, 4), (0, C_pad - C_tot)).reshape(1, C_pad)

        out_flat = pl.pallas_call(
            _bn_relu_kernel,
            out_shape=jax.ShapeDtypeStruct((R_pad, C_pad), store_dtype),
            grid_spec=pltpu.PrefetchScalarGridSpec(
                num_scalar_prefetch=0, grid=(n2,),
                in_specs=[y2_spec, chan_spec, chan_spec],
                out_specs=y2_spec),
            input_output_aliases={0: 0},          # write the result over y
            compiler_params=_compiler_params(TM2 * C_pad * ssz, 2 * C_pad * 4,
                                             TM2 * C_pad * ssz),
            cost_estimate=pl.CostEstimate(
                flops=2 * R_pad * C_pad,
                transcendentals=0,
                bytes_accessed=2 * R_pad * C_pad * ssz + 2 * C_pad * 4),
        )(y, scale_p, shift_p)

    # --- interleave the 4 parity groups back into the (Ho, Wo) output grid ---
    out_g = out_flat[:R, :C_tot].astype(jnp.float32).reshape(N, Hg, Wg, 4, Cout)
    out = jnp.zeros((N, Ho, Wo, Cout), jnp.float32)
    out = out.at[:, 0::2, 0::2, :].set(out_g[:, :, :, 0, :])
    out = out.at[:, 0::2, 1::2, :].set(out_g[:, :, :W, 1, :])
    out = out.at[:, 1::2, 0::2, :].set(out_g[:, :H, :, 2, :])
    out = out.at[:, 1::2, 1::2, :].set(out_g[:, :H, :W, 3, :])
    # NCHW kept only to match the PyTorch module's interface.
    return jnp.transpose(out, (0, 3, 1, 2))


# ---------------------------- pure-JAX reference -----------------------------
def gen_block_ref(x, w_t, bias, gamma, beta, *, stride=2, is_last_block=False):
    k = w_t.shape[2]
    w_conv = jnp.transpose(w_t, (1, 0, 2, 3))[:, :, ::-1, ::-1]       # (Cout,Cin,k,k)
    y = jax.lax.conv_general_dilated(
        x.astype(jnp.float32), w_conv.astype(jnp.float32),
        window_strides=(1, 1), padding=[(k - 1, k - 1), (k - 1, k - 1)],
        lhs_dilation=(stride, stride),
        dimension_numbers=("NCHW", "OIHW", "NCHW"))
    y = y + bias.reshape(1, -1, 1, 1)
    if is_last_block:
        return jnp.tanh(y)
    mean = jnp.mean(y, axis=(0, 2, 3), keepdims=True)
    var = jnp.mean((y - mean) ** 2, axis=(0, 2, 3), keepdims=True)
    y_hat = (y - mean) * jax.lax.rsqrt(var + 1e-5)
    return jnp.maximum(y_hat * gamma.reshape(1, -1, 1, 1)
                       + beta.reshape(1, -1, 1, 1), 0.0)


# --------------------------------- main ---------------------------------------
if __name__ == "__main__":
    key = jax.random.PRNGKey(0)
    N, Cin, Cout, H, W, k, stride = 2, 4, 8, 8, 8, 3, 2

    k_x, k_w, k_b, k_g, k_be = jax.random.split(key, 5)
    x = jax.random.normal(k_x, (N, Cin, H, W), jnp.float32)
    w_t = 0.1 * jax.random.normal(k_w, (Cin, Cout, k, k), jnp.float32)   # ConvT weight
    bias = 0.1 * jax.random.normal(k_b, (Cout,), jnp.float32)
    gamma = 1.0 + 0.1 * jax.random.normal(k_g, (Cout,), jnp.float32)
    beta = 0.1 * jax.random.normal(k_be, (Cout,), jnp.float32)

    for last in (False, True):
        ref = gen_block_ref(x, w_t, bias, gamma, beta,
                            stride=stride, is_last_block=last)

        # Validation-only configuration (f32 everywhere): tight tolerance.
        out_f32 = jax.block_until_ready(
            gen_block(x, w_t, bias, gamma, beta, stride=stride, is_last_block=last,
                      matmul_dtype=jnp.float32))
        np.testing.assert_allclose(np.asarray(out_f32), np.asarray(ref),
                                   rtol=2e-4, atol=2e-4)

        # Production configuration (bf16 MXU inputs + bf16 stored activations,
        # f32 accumulation / statistics): reduced-precision tolerance.
        out_bf16 = jax.block_until_ready(
            gen_block(x, w_t, bias, gamma, beta, stride=stride, is_last_block=last,
                      matmul_dtype=jnp.bfloat16))
        np.testing.assert_allclose(np.asarray(out_bf16), np.asarray(ref),
                                   rtol=5e-2, atol=5e-2)

    print("KERNEL_OK")
</pallas_src>

<mosaic_0001>
module attributes {stable_mosaic.version = 11 : i64} {
  func.func @_matmul_stats_kernel(%arg0: i32, %arg1: memref<168x128xf32, #tpu.memory_space<vmem>>, %arg2: memref<128x128xf32, #tpu.memory_space<vmem>>, %arg3: memref<168x128xf32, #tpu.memory_space<vmem>>, %arg4: memref<1x1x128xf32, #tpu.memory_space<vmem>>, %arg5: memref<1x1x128xf32, #tpu.memory_space<vmem>>) attributes {dimension_semantics = [#tpu.dimension_semantics<parallel>], iteration_bounds = array<i64: 1>, scalar_prefetch = 0 : i64, scratch_operands = 0 : i64, tpu.core_type = #tpu.core_type<tc>, window_params = [{transform_indices = @transform_0, window_bounds = array<i64: 168, 128>}, {pipeline_mode = #tpu.pipeline_mode<synchronous>, transform_indices = @transform_1, window_bounds = array<i64: 128, 128>}, {transform_indices = @transform_2, window_bounds = array<i64: 168, 128>}, {transform_indices = @transform_3, window_bounds = array<i64: 1, 1, 128>}, {transform_indices = @transform_4, window_bounds = array<i64: 1, 1, 128>}]} {
    %c0 = arith.constant 0 : index
    %c0_0 = arith.constant 0 : index
    %0 = vector.load %arg1[%c0, %c0_0] : memref<168x128xf32, #tpu.memory_space<vmem>>, vector<168x128xf32>
    %c0_1 = arith.constant 0 : index
    %c0_2 = arith.constant 0 : index
    %1 = vector.load %arg2[%c0_1, %c0_2] : memref<128x128xf32, #tpu.memory_space<vmem>>, vector<128x128xf32>
    %cst = arith.constant dense<0.000000e+00> : vector<168x128xf32>
    %2 = tpu.matmul %0, %1, %cst {dimension_numbers = #tpu.dot_dimension_numbers<[1], [0], [0], [1], [0, 0, 1, 1], [], []>} : vector<168x128xf32>, vector<128x128xf32>, vector<168x128xf32> -> vector<168x128xf32>
    %c0_3 = arith.constant 0 : index
    %c0_4 = arith.constant 0 : index
    %3 = vector.load %arg3[%c0_3, %c0_4] : memref<168x128xf32, #tpu.memory_space<vmem>>, vector<168x128xf32>
    tpu.vector_store %arg3[%c0_3, %c0_4], %2 {strides = array<i32>} : memref<168x128xf32, #tpu.memory_space<vmem>>, vector<168x128xf32>,
    %cst_5 = arith.constant dense<0.000000e+00> : vector<128xf32>
    %4 = vector.multi_reduction <add>, %2, %cst_5 [0] : vector<168x128xf32> to vector<128xf32>
    %5 = vector.shape_cast %4 : vector<128xf32> to vector<1x128xf32>
    %6 = vector.shape_cast %5 : vector<1x128xf32> to vector<1x1x128xf32>
    %c0_6 = arith.constant 0 : index
    %c0_7 = arith.constant 0 : index
    %c0_8 = arith.constant 0 : index
    %7 = vector.load %arg4[%c0_6, %c0_7, %c0_8] : memref<1x1x128xf32, #tpu.memory_space<vmem>>, vector<1x1x128xf32>
    tpu.vector_store %arg4[%c0_6, %c0_7, %c0_8], %6 {strides = array<i32>} : memref<1x1x128xf32, #tpu.memory_space<vmem>>, vector<1x1x128xf32>,
    %8 = arith.mulf %2, %2 : vector<168x128xf32>
    %cst_9 = arith.constant dense<0.000000e+00> : vector<128xf32>
    %9 = vector.multi_reduction <add>, %8, %cst_9 [0] : vector<168x128xf32> to vector<128xf32>
    %10 = vector.shape_cast %9 : vector<128xf32> to vector<1x128xf32>
    %11 = vector.shape_cast %10 : vector<1x128xf32> to vector<1x1x128xf32>
    %c0_10 = arith.constant 0 : index
    %c0_11 = arith.constant 0 : index
    %c0_12 = arith.constant 0 : index
    %12 = vector.load %arg5[%c0_10, %c0_11, %c0_12] : memref<1x1x128xf32, #tpu.memory_space<vmem>>, vector<1x1x128xf32>
    tpu.vector_store %arg5[%c0_10, %c0_11, %c0_12], %11 {strides = array<i32>} : memref<1x1x128xf32, #tpu.memory_space<vmem>>, vector<1x1x128xf32>,
    return
  }
  func.func @transform_0(%arg0: i32) -> (i32, i32) {
    %c0_i32 = arith.constant 0 : i32
    %c0_i32_0 = arith.constant 0 : i32
    return %arg0, %c0_i32 : i32, i32
  }
  func.func @transform_1(%arg0: i32) -> (i32, i32) {
    %c0_i32 = arith.constant 0 : i32
    %c0_i32_0 = arith.constant 0 : i32
    %c0_i32_1 = arith.constant 0 : i32
    return %c0_i32, %c0_i32_0 : i32, i32
  }
  func.func @transform_2(%arg0: i32) -> (i32, i32) {
    %c0_i32 = arith.constant 0 : i32
    %c0_i32_0 = arith.constant 0 : i32
    return %arg0, %c0_i32 : i32, i32
  }
  func.func @transform_3(%arg0: i32) -> (i32, i32, i32) {
    %c0_i32 = arith.constant 0 : i32
    %c0_i32_0 = arith.constant 0 : i32
    %c0_i32_1 = arith.constant 0 : i32
    return %arg0, %c0_i32, %c0_i32_0 : i32, i32, i32
  }
  func.func @transform_4(%arg0: i32) -> (i32, i32, i32) {
    %c0_i32 = arith.constant 0 : i32
    %c0_i32_0 = arith.constant 0 : i32
    %c0_i32_1 = arith.constant 0 : i32
    return %arg0, %c0_i32, %c0_i32_0 : i32, i32, i32
  }
}

module attributes {stable_mosaic.version = 11 : i64} {
  func.func @_bn_relu_kernel(%arg0: i32, %arg1: memref<168x128xf32, #tpu.memory_space<vmem>>, %arg2: memref<1x128xf32, #tpu.memory_space<vmem>>, %arg3: memref<1x128xf32, #tpu.memory_space<vmem>>, %arg4: memref<168x128xf32, #tpu.memory_space<vmem>>) attributes {dimension_semantics = [#tpu.dimension_semantics<parallel>], iteration_bounds = array<i64: 1>, scalar_prefetch = 0 : i64, scratch_operands = 0 : i64, tpu.core_type = #tpu.core_type<tc>, window_params = [{transform_indices = @transform_0, window_bounds = array<i64: 168, 128>}, {pipeline_mode = #tpu.pipeline_mode<synchronous>, transform_indices = @transform_1, window_bounds = array<i64: 1, 128>}, {pipeline_mode = #tpu.pipeline_mode<synchronous>, transform_indices = @transform_2, window_bounds = array<i64: 1, 128>}, {transform_indices = @transform_3, window_bounds = array<i64: 168, 128>}]} {
    %c0 = arith.constant 0 : index
    %c0_0 = arith.constant 0 : index
    %0 = vector.load %arg1[%c0, %c0_0] : memref<168x128xf32, #tpu.memory_space<vmem>>, vector<168x128xf32>
    %c0_1 = arith.constant 0 : index
    %c0_2 = arith.constant 0 : index
    %1 = vector.load %arg2[%c0_1, %c0_2] : memref<1x128xf32, #tpu.memory_space<vmem>>, vector<1x128xf32>
    %2 = vector.broadcast %1 : vector<1x128xf32> to vector<168x128xf32>
    %3 = arith.mulf %0, %2 : vector<168x128xf32>
    %c0_3 = arith.constant 0 : index
    %c0_4 = arith.constant 0 : index
    %4 = vector.load %arg3[%c0_3, %c0_4] : memref<1x128xf32, #tpu.memory_space<vmem>>, vector<1x128xf32>
    %5 = vector.broadcast %4 : vector<1x128xf32> to vector<168x128xf32>
    %6 = arith.addf %3, %5 : vector<168x128xf32>
    %cst = arith.constant 0.000000e+00 : f32
    %7 = vector.broadcast %cst : f32 to vector<168x128xf32>
    %8 = arith.maximumf %6, %7 : vector<168x128xf32>
    %c0_5 = arith.constant 0 : index
    %c0_6 = arith.constant 0 : index
    %9 = vector.load %arg4[%c0_5, %c0_6] : memref<168x128xf32, #tpu.memory_space<vmem>>, vector<168x128xf32>
    tpu.vector_store %arg4[%c0_5, %c0_6], %8 {strides = array<i32>} : memref<168x128xf32, #tpu.memory_space<vmem>>, vector<168x128xf32>,
    return
  }
  func.func @transform_0(%arg0: i32) -> (i32, i32) {
    %c0_i32 = arith.constant 0 : i32
    %c0_i32_0 = arith.constant 0 : i32
    return %arg0, %c0_i32 : i32, i32
  }
  func.func @transform_1(%arg0: i32) -> (i32, i32) {
    %c0_i32 = arith.constant 0 : i32
    %c0_i32_0 = arith.constant 0 : i32
    %c0_i32_1 = arith.constant 0 : i32
    return %c0_i32, %c0_i32_0 : i32, i32
  }
  func.func @transform_2(%arg0: i32) -> (i32, i32) {
    %c0_i32 = arith.constant 0 : i32
    %c0_i32_0 = arith.constant 0 : i32
    %c0_i32_1 = arith.constant 0 : i32
    return %c0_i32, %c0_i32_0 : i32, i32
  }
  func.func @transform_3(%arg0: i32) -> (i32, i32) {
    %c0_i32 = arith.constant 0 : i32
    %c0_i32_0 = arith.constant 0 : i32
    return %arg0, %c0_i32 : i32, i32
  }
}

</mosaic_0001>

<bundles_post_ra>
// kernel: tile.18
= control target key start
LH: loop header
LB: loop body
LE: loop exit
PB: predicated region body
PF: predicated region fallthrough
CT: control target
= control target key end

     0   :  { %s22_s0 = inlined_call_operand.vmem [shape: f32[8], index: 0, kind: input, shape index: {}]   ;;  %s23_s1 = inlined_call_operand.vmem [shape: f32[4,8], index: 1, kind: output, shape index: {}]  }
   0x1   :  { %v4_v0 = vld [vmem:[%s22_s0] ss:$0 sm:$0xff] }
   0x2   :  { %5 = vst [vmem:[%s23_s1] sm:$0xf] %v4_v0 }

// kernel: tile.19
= control target key start
LH: loop header
LB: loop body
LE: loop exit
PB: predicated region body
PF: predicated region fallthrough
CT: control target
= control target key end

     0   :  { %vm8_vm0 = vcmask 64512   ;;  %s40_s8 = smov 8   ;;  %s41_s9 = smov 16   ;;  %vm14_vm1 = vcmask 261312   ;;  %vm20_vm2 = vcmask 195712   ;;  %vm26_vm3 = vcmask 130112   ;;  %s58_s0 = inlined_call_operand.vmem [shape: f32[4,8], index: 0, kind: input, shape index: {}]   ;;  %s59_s1 = inlined_call_operand.vmem [shape: f32[32], index: 1, kind: output, shape index: {}]  }
   0x1   :  { %v5_v0 = vld [vmem:[%s58_s0] sm:$0xf]  ;;  %s39_s0 = smov 24  }
   0x2   :  { %6 = vst [vmem:[#allocation1] sm:$0xf] %v5_v0 }
   0x9   :  { %v11_v1 = vld [vmem:[#allocation1 + $0x3] sm:$0x1]   ;;  %v23_v2 = vld [vmem:[#allocation1 + $0x1] sm:$0x1]   ;;  %v7_v3 = vld [vmem:[#allocation1] sm:$0x1]  }
   0xa   :  { %12 = vrot.lane.b32.xlu0 %v11_v1, %s39_s0  ;;  %24 = vrot.lane.b32.xlu1 %v23_v2, %s40_s8  ;;  %v17_v4 = vld [vmem:[#allocation1 + $0x2] sm:$0x1]   ;;  %9 = vst.msk [vmem:[#allocation0] sm:$0x1] %vm8_vm0, %v7_v3  }
   0xe   :  { %18 = vrot.lane.b32.xlu0 %v17_v4, %s41_s9 }
  0x7c   :  { %v13_v5 = vpop.permute.xlu0 %12   ;;  %v25_v6 = vpop.permute.xlu1 %24  }
  0x7d   :  { %15 = vst.msk [vmem:[#allocation0] sm:$0x1] %vm14_vm1, %v13_v5  }
  0x80   :  { %v19_v7 = vpop.permute.xlu0 %18  }
  0x81   :  { %21 = vst.msk [vmem:[#allocation0] sm:$0x1] %vm20_vm2, %v19_v7  }
  0x82   :  { %27 = vst.msk [vmem:[#allocation0] sm:$0x1] %vm26_vm3, %v25_v6  }
  0x89   :  { %v32_v8 = vld [vmem:[#allocation0] sm:$0x1] }
  0x8a   :  { %35 = vst [vmem:[%s59_s1] sm:$0x1] %v32_v8 }

// kernel: gen_block.3
= control target key start
LH: loop header
LB: loop body
LE: loop exit
PB: predicated region body
PF: predicated region fallthrough
CT: control target
= control target key end

     0   :  { %s337_s0 = inlined_call_operand.vmem [shape: f32[168,128], index: 0, kind: input, shape index: {}, may-alias: {0,3}]   ;;  %s338_s1 = inlined_call_operand.vmem [shape: f32[1,128], index: 1, kind: input, shape index: {}]   ;;  %s339_s2 = inlined_call_operand.vmem [shape: f32[1,128], index: 2, kind: input, shape index: {}]   ;;  %s340_s3 = inlined_call_operand.vmem [shape: f32[168,128], index: 3, kind: output, shape index: {}, may-alias: {0,3}]  }
   0x1   :  { %v14_v0 = vld [vmem:[%s337_s0] sm:$0xff]  ;;  %v15_v4 = vld [vmem:[%s337_s0 + $0x8] sm:$0xff]  ;;  %v16_v5 = vld [vmem:[%s337_s0 + $0x10] sm:$0xff] }
   0x2   :  { %v165_v1 = vld [vmem:[%s338_s1] ss:$0 sm:$0xff]  ;;  %v17_v6 = vld [vmem:[%s337_s0 + $0x18] sm:$0xff]  ;;  %v19_v11 = vld [vmem:[%s337_s0 + $0x28] sm:$0xff] }
   0x3   :  { %v170_v2 = vld [vmem:[%s339_s2] ss:$0 sm:$0xff]  ;;  %v42_v3 = vmul.f32 %v165_v1, %v14_v0  ;;  %v43_v7 = vmul.f32 %v165_v1, %v15_v4  ;;  %v44_v8 = vmul.f32 %v165_v1, %v16_v5  ;;  %v45_v9 = vmul.f32 %v165_v1, %v17_v6  ;;  %v20_v12 = vld [vmem:[%s337_s0 + $0x30] sm:$0xff]  ;;  %v21_v17 = vld [vmem:[%s337_s0 + $0x38] sm:$0xff] }
   0x4   :  { %v18_v10 = vld [vmem:[%s337_s0 + $0x20] sm:$0xff]  ;;  %v47_v15 = vmul.f32 %v165_v1, %v19_v11  ;;  %v48_v16 = vmul.f32 %v165_v1, %v20_v12  ;;  %v49_v21 = vmul.f32 %v165_v1, %v21_v17  ;;  %v23_v27 = vld [vmem:[%s337_s0 + $0x48] sm:$0xff]  ;;  %v24_v28 = vld [vmem:[%s337_s0 + $0x50] sm:$0xff] }
   0x5   :  { %v70_v13 = vadd.f32 %v170_v2, %v42_v3  ;;  %v46_v14 = vmul.f32 %v165_v1, %v18_v10  ;;  %v71_v18 = vadd.f32 %v170_v2, %v43_v7  ;;  %v72_v19 = vadd.f32 %v170_v2, %v44_v8  ;;  %v22_v22 = vld [vmem:[%s337_s0 + $0x40] sm:$0xff]  ;;  %v25_v29 = vld [vmem:[%s337_s0 + $0x58] sm:$0xff]  ;;  %v27_v35 = vld [vmem:[%s337_s0 + $0x68] sm:$0xff] }
   0x6   :  { %v73_v20 = vadd.f32 %v170_v2, %v45_v9  ;;  %v75_v25 = vadd.f32 %v170_v2, %v47_v15  ;;  %v76_v26 = vadd.f32 %v170_v2, %v48_v16  ;;  %v77_v33 = vadd.f32 %v170_v2, %v49_v21  ;;  %v26_v34 = vld [vmem:[%s337_s0 + $0x60] sm:$0xff]  ;;  %v28_v36 = vld [vmem:[%s337_s0 + $0x70] sm:$0xff] }
   0x7   :  { %v91_v23 = vmax.f32 %v70_v13, 0.0  ;;  %v74_v24 = vadd.f32 %v170_v2, %v46_v14  ;;  %v92_v30 = vmax.f32 %v71_v18, 0.0  ;;  %v93_v31 = vmax.f32 %v72_v19, 0.0 }
   0x8   :  { %v94_v32 = vmax.f32 %v73_v20, 0.0  ;;  %v96_v38 = vmax.f32 %v75_v25, 0.0  ;;  %v97_v39 = vmax.f32 %v76_v26, 0.0  ;;  %v50_v40 = vmul.f32 %v165_v1, %v22_v22 }
   0x9   :  { %112 = vst [vmem:[%s340_s3] sm:$0xff] %v91_v23  ;;  %v95_v37 = vmax.f32 %v74_v24, 0.0  ;;  %v98_v42 = vmax.f32 %v77_v33, 0.0  ;;  %v51_v43 = vmul.f32 %v165_v1, %v23_v27  ;;  %v52_v44 = vmul.f32 %v165_v1, %v24_v28 }
   0xa   :  { %v53_v45 = vmul.f32 %v165_v1, %v25_v29  ;;  %v78_v46 = vadd.f32 %v170_v2, %v50_v40  ;;  %v54_v47 = vmul.f32 %v165_v1, %v26_v34  ;;  %v55_v48 = vmul.f32 %v165_v1, %v27_v35 }
   0xb   :  { %v56_v49 = vmul.f32 %v165_v1, %v28_v36  ;;  %v79_v50 = vadd.f32 %v170_v2, %v51_v43  ;;  %v80_v51 = vadd.f32 %v170_v2, %v52_v44 }
   0xc   :  { %v81_v52 = vadd.f32 %v170_v2, %v53_v45  ;;  %v99_v55 = vmax.f32 %v78_v46, 0.0  ;;  %v82_v56 = vadd.f32 %v170_v2, %v54_v47  ;;  %v83_v57 = vadd.f32 %v170_v2, %v55_v48 }
   0xd   :  { %v84_v58 = vadd.f32 %v170_v2, %v56_v49  ;;  %v100_v62 = vmax.f32 %v79_v50, 0.0  ;;  %v101_v63 = vmax.f32 %v80_v51, 0.0 }
   0xe   :  { %v102_v0 = vmax.f32 %v81_v52, 0.0  ;;  %v103_v5 = vmax.f32 %v82_v56, 0.0  ;;  %v104_v6 = vmax.f32 %v83_v57, 0.0 }
   0xf   :  { %v105_v7 = vmax.f32 %v84_v58, 0.0 }
  0x10   :  { %v29_v41 = vld [vmem:[%s337_s0 + $0x78] sm:$0xff] }
  0x11   :  { %113 = vst [vmem:[%s340_s3 + $0x8] sm:$0xff] %v92_v30  ;;  %114 = vst [vmem:[%s340_s3 + $0x10] sm:$0xff] %v93_v31  ;;  %v57_v53 = vmul.f32 %v165_v1, %v29_v41 }
  0x12   :  { %115 = vst [vmem:[%s340_s3 + $0x18] sm:$0xff] %v94_v32  ;;  %116 = vst [vmem:[%s340_s3 + $0x20] sm:$0xff] %v95_v37 }
  0x13   :  { %117 = vst [vmem:[%s340_s3 + $0x28] sm:$0xff] %v96_v38  ;;  %118 = vst [vmem:[%s340_s3 + $0x30] sm:$0xff] %v97_v39  ;;  %v85_v3 = vadd.f32 %v170_v2, %v57_v53 }
  0x14   :  { %119 = vst [vmem:[%s340_s3 + $0x38] sm:$0xff] %v98_v42 }
  0x15   :  { %v106_v9 = vmax.f32 %v85_v3, 0.0 }
  0x1b   :  { %v30_v54 = vld [vmem:[%s337_s0 + $0x80] sm:$0xff]  ;;  %v31_v59 = vld [vmem:[%s337_s0 + $0x88] sm:$0xff]  ;;  %v32_v60 = vld [vmem:[%s337_s0 + $0x90] sm:$0xff] }
  0x1c   :  { %v33_v61 = vld [vmem:[%s337_s0 + $0x98] sm:$0xff]  ;;  %v34_v4 = vld [vmem:[%s337_s0 + $0xa0] sm:$0xff]  ;;  %v58_v8 = vmul.f32 %v165_v1, %v30_v54  ;;  %v59_v10 = vmul.f32 %v165_v1, %v31_v59  ;;  %v60_v11 = vmul.f32 %v165_v1, %v32_v60 }
  0x1d   :  { %120 = vst [vmem:[%s340_s3 + $0x40] sm:$0xff] %v99_v55  ;;  %121 = vst [vmem:[%s340_s3 + $0x48] sm:$0xff] %v100_v62  ;;  %v61_v12 = vmul.f32 %v165_v1, %v33_v61  ;;  %v62_v14 = vmul.f32 %v165_v1, %v34_v4 }
  0x1e   :  { %122 = vst [vmem:[%s340_s3 + $0x50] sm:$0xff] %v101_v63  ;;  %123 = vst [vmem:[%s340_s3 + $0x58] sm:$0xff] %v102_v0  ;;  %v86_v13 = vadd.f32 %v170_v2, %v58_v8  ;;  %v87_v15 = vadd.f32 %v170_v2, %v59_v10  ;;  %v88_v16 = vadd.f32 %v170_v2, %v60_v11 }
  0x1f   :  { %124 = vst [vmem:[%s340_s3 + $0x60] sm:$0xff] %v103_v5  ;;  %125 = vst [vmem:[%s340_s3 + $0x68] sm:$0xff] %v104_v6  ;;  %v89_v17 = vadd.f32 %v170_v2, %v61_v12  ;;  %v90_v19 = vadd.f32 %v170_v2, %v62_v14 }
  0x20   :  { %126 = vst [vmem:[%s340_s3 + $0x70] sm:$0xff] %v105_v7  ;;  %127 = vst [vmem:[%s340_s3 + $0x78] sm:$0xff] %v106_v9  ;;  %v107_v18 = vmax.f32 %v86_v13, 0.0  ;;  %v108_v20 = vmax.f32 %v87_v15, 0.0  ;;  %v109_v21 = vmax.f32 %v88_v16, 0.0 }
  0x21   :  { %v110_v22 = vmax.f32 %v89_v17, 0.0  ;;  %v111_v1 = vmax.f32 %v90_v19, 0.0 }
  0x22   :  { %128 = vst [vmem:[%s340_s3 + $0x80] sm:$0xff] %v107_v18  ;;  %129 = vst [vmem:[%s340_s3 + $0x88] sm:$0xff] %v108_v20 }
  0x23   :  { %130 = vst [vmem:[%s340_s3 + $0x90] sm:$0xff] %v109_v21  ;;  %131 = vst [vmem:[%s340_s3 + $0x98] sm:$0xff] %v110_v22 }
  0x24   :  { %132 = vst [vmem:[%s340_s3 + $0xa0] sm:$0xff] %v111_v1 }

// kernel: gen_block.2
= control target key start
LH: loop header
LB: loop body
LE: loop exit
PB: predicated region body
PF: predicated region fallthrough
CT: control target
= control target key end

     0   :  { %v495_v0 = vmov 0.0   ;;  %vm496_vm0 = vmmov 0   ;;  %s818_s1 = inlined_call_operand.vmem [shape: f32[128,128], index: 1, kind: input, shape index: {}]   ;;  %s819_s0 = inlined_call_operand.vmem [shape: f32[168,128], index: 0, kind: input, shape index: {}]   ;;  %s820_s2 = inlined_call_operand.vmem [shape: f32[168,128], index: 2, kind: output, shape index: {0}]   ;;  %s821_s3 = inlined_call_operand.vmem [shape: f32[1,1,128], index: 3, kind: output, shape index: {1}]   ;;  %s822_s4 = inlined_call_operand.vmem [shape: f32[1,1,128], index: 4, kind: output, shape index: {2}]  }
   0x1   :  { %366 = vmatprep.subr.mxu0 %v495_v0  ;;  %v50_v1 = vld [vmem:[%s818_s1 + $0x78] sm:$0xff]  ;;  %v49_v2 = vld [vmem:[%s818_s1 + $0x70] sm:$0xff]  ;;  %461 = vmatprep.subr.mxu1 %v495_v0  ;;  %v48_v3 = vld [vmem:[%s818_s1 + $0x68] sm:$0xff] }
   0x2   :  { %367 = vmatpush3.msra.mxu0 %v50_v1  ;;  %477 = vmatpush3.msra.mxu1 %v50_v1  ;;  %v47_v4 = vld [vmem:[%s818_s1 + $0x60] sm:$0xff]  ;;  %v46_v5 = vld [vmem:[%s818_s1 + $0x58] sm:$0xff]  ;;  %v45_v6 = vld [vmem:[%s818_s1 + $0x50] sm:$0xff] }
   0x3   :  { %368 = vmatprep.subr.mxu0 %v495_v0  ;;  %462 = vmatprep.subr.mxu1 %v495_v0  ;;  %v44_v7 = vld [vmem:[%s818_s1 + $0x48] sm:$0xff]  ;;  %v43_v8 = vld [vmem:[%s818_s1 + $0x40] sm:$0xff]  ;;  %v42_v9 = vld [vmem:[%s818_s1 + $0x38] sm:$0xff] }
   0x4   :  { %369 = vmatpush3.msra.mxu0 %v49_v2  ;;  %478 = vmatpush3.msra.mxu1 %v49_v2  ;;  %v41_v10 = vld [vmem:[%s818_s1 + $0x30] sm:$0xff]  ;;  %v40_v11 = vld [vmem:[%s818_s1 + $0x28] sm:$0xff]  ;;  %v39_v12 = vld [vmem:[%s818_s1 + $0x20] sm:$0xff] }
   0x5   :  { %370 = vmatprep.subr.mxu0 %v495_v0  ;;  %463 = vmatprep.subr.mxu1 %v495_v0  ;;  %v38_v13 = vld [vmem:[%s818_s1 + $0x18] sm:$0xff]  ;;  %v37_v14 = vld [vmem:[%s818_s1 + $0x10] sm:$0xff]  ;;  %v36_v15 = vld [vmem:[%s818_s1 + $0x8] sm:$0xff] }
   0x6   :  { %371 = vmatpush3.msra.mxu0 %v48_v3  ;;  %479 = vmatpush3.msra.mxu1 %v48_v3  ;;  %v35_v16 = vld [vmem:[%s818_s1] sm:$0xff]  ;;  %v25_v18 = vld [vmem:[%s819_s0 + $0x58] sm:$0xff]  ;;  %v15_v19 = vld [vmem:[%s819_s0 + $0x8] sm:$0xff] }
   0x7   :  { %372 = vmatprep.subr.mxu0 %v495_v0  ;;  %464 = vmatprep.subr.mxu1 %v495_v0  ;;  %v14_v17 = vld [vmem:[%s819_s0] sm:$0xff]  ;;  %v16_v21 = vld [vmem:[%s819_s0 + $0x10] sm:$0xff]  ;;  %v27_v22 = vld [vmem:[%s819_s0 + $0x68] sm:$0xff] }
   0x8   :  { %373 = vmatpush3.msra.mxu0 %v47_v4  ;;  %480 = vmatpush3.msra.mxu1 %v47_v4  ;;  %v26_v20 = vld [vmem:[%s819_s0 + $0x60] sm:$0xff]  ;;  %v17_v23 = vld [vmem:[%s819_s0 + $0x18] sm:$0xff]  ;;  %v28_v24 = vld [vmem:[%s819_s0 + $0x70] sm:$0xff] }
   0x9   :  { %374 = vmatprep.subr.mxu0 %v495_v0  ;;  %465 = vmatprep.subr.mxu1 %v495_v0  ;;  %v18_v25 = vld [vmem:[%s819_s0 + $0x20] sm:$0xff]  ;;  %v29_v26 = vld [vmem:[%s819_s0 + $0x78] sm:$0xff]  ;;  %v19_v27 = vld [vmem:[%s819_s0 + $0x28] sm:$0xff] }
   0xa   :  { %375 = vmatpush3.msra.mxu0 %v46_v5  ;;  %481 = vmatpush3.msra.mxu1 %v46_v5  ;;  %v30_v28 = vld [vmem:[%s819_s0 + $0x80] sm:$0xff]  ;;  %v20_v29 = vld [vmem:[%s819_s0 + $0x30] sm:$0xff]  ;;  %v31_v30 = vld [vmem:[%s819_s0 + $0x88] sm:$0xff] }
   0xb   :  { %376 = vmatprep.subr.mxu0 %v495_v0  ;;  %398 = vmatprep.mubr.msk.f32.mxu0 %vm496_vm0, %v495_v0  ;;  %v21_v31 = vld [vmem:[%s819_s0 + $0x38] sm:$0xff]  ;;  %v32_v32 = vld [vmem:[%s819_s0 + $0x90] sm:$0xff]  ;;  %v22_v33 = vld [vmem:[%s819_s0 + $0x40] sm:$0xff] }
   0xc   :  { %377 = vmatpush3.msra.mxu0 %v45_v6  ;;  %466 = vmatprep.subr.mxu1 %v495_v0  ;;  %v33_v34 = vld [vmem:[%s819_s0 + $0x98] sm:$0xff]  ;;  %v23_v35 = vld [vmem:[%s819_s0 + $0x48] sm:$0xff]  ;;  %v34_v36 = vld [vmem:[%s819_s0 + $0xa0] sm:$0xff] }
   0xd   :  { %378 = vmatprep.subr.mxu0 %v495_v0  ;;  %482 = vmatpush3.msra.mxu1 %v45_v6  ;;  %v24_v37 = vld [vmem:[%s819_s0 + $0x50] sm:$0xff] }
   0xe   :  { %379 = vmatpush3.msra.mxu0 %v44_v7  ;;  %467 = vmatprep.subr.mxu1 %v495_v0 }
   0xf   :  { %380 = vmatprep.subr.mxu0 %v495_v0  ;;  %483 = vmatpush3.msra.mxu1 %v44_v7 }
  0x10   :  { %381 = vmatpush3.msra.mxu0 %v43_v8  ;;  %468 = vmatprep.subr.mxu1 %v495_v0 }
  0x11   :  { %382 = vmatprep.subr.mxu0 %v495_v0  ;;  %484 = vmatpush3.msra.mxu1 %v43_v8 }
  0x12   :  { %383 = vmatpush3.msra.mxu0 %v42_v9  ;;  %469 = vmatprep.subr.mxu1 %v495_v0 }
  0x13   :  { %384 = vmatprep.subr.mxu0 %v495_v0  ;;  %485 = vmatpush3.msra.mxu1 %v42_v9 }
  0x14   :  { %385 = vmatpush3.msra.mxu0 %v41_v10  ;;  %470 = vmatprep.subr.mxu1 %v495_v0 }
  0x15   :  { %386 = vmatprep.subr.mxu0 %v495_v0  ;;  %486 = vmatpush3.msra.mxu1 %v41_v10 }
  0x16   :  { %387 = vmatpush3.msra.mxu0 %v40_v11  ;;  %471 = vmatprep.subr.mxu1 %v495_v0 }
  0x17   :  { %388 = vmatprep.subr.mxu0 %v495_v0  ;;  %487 = vmatpush3.msra.mxu1 %v40_v11 }
  0x18   :  { %389 = vmatpush3.msra.mxu0 %v39_v12  ;;  %472 = vmatprep.subr.mxu1 %v495_v0 }
  0x19   :  { %390 = vmatprep.subr.mxu0 %v495_v0  ;;  %488 = vmatpush3.msra.mxu1 %v39_v12 }
  0x1a   :  { %391 = vmatpush3.msra.mxu0 %v38_v13  ;;  %473 = vmatprep.subr.mxu1 %v495_v0 }
  0x1b   :  { %392 = vmatprep.subr.mxu0 %v495_v0  ;;  %489 = vmatpush3.msra.mxu1 %v38_v13 }
  0x1c   :  { %393 = vmatpush3.msra.mxu0 %v37_v14  ;;  %474 = vmatprep.subr.mxu1 %v495_v0 }
  0x1d   :  { %394 = vmatprep.subr.mxu0 %v495_v0  ;;  %490 = vmatpush3.msra.mxu1 %v37_v14 }
  0x1e   :  { %395 = vmatpush3.msra.mxu0 %v36_v15  ;;  %475 = vmatprep.subr.mxu1 %v495_v0 }
  0x1f   :  { %396 = vmatprep.subr.mxu0 %v495_v0  ;;  %491 = vmatpush3.msra.mxu1 %v36_v15 }
  0x20   :  { %397 = vmatpush3.msra.mxu0 %v35_v16  ;;  %476 = vmatprep.subr.mxu1 %v495_v0 }
  0x21   :  { %399 = vmatmul.mubr.f32.vlgmr.msra.gmra.mxu0 %v14_v17  ;;  %492 = vmatpush3.msra.mxu1 %v35_v16 }
  0x22   :  { %401 = vmatprep.mubr.msk.f32.mxu0 %vm496_vm0, %v495_v0  ;;  %431 = vmatprep.mubr.msk.f32.mxu1 %vm496_vm0, %v495_v0 }
  0x23   :  { %432 = vmatmul.mubr.f32.vlgmr.msra.gmra.mxu1 %v25_v18 }
  0x24   :  { %434 = vmatprep.mubr.msk.f32.mxu1 %vm496_vm0, %v495_v0 }
  0x25   :  { %402 = vmatmul.mubr.f32.gmra.mxu0 %v15_v19 }
  0x26   :  { %404 = vmatprep.mubr.msk.f32.mxu0 %vm496_vm0, %v495_v0 }
  0x27   :  { %435 = vmatmul.mubr.f32.gmra.mxu1 %v26_v20 }
  0x28   :  { %437 = vmatprep.mubr.msk.f32.mxu1 %vm496_vm0, %v495_v0 }
  0x29   :  { %405 = vmatmul.mubr.f32.gmra.mxu0 %v16_v21 }
  0x2a   :  { %407 = vmatprep.mubr.msk.f32.mxu0 %vm496_vm0, %v495_v0 }
  0x2b   :  { %438 = vmatmul.mubr.f32.gmra.mxu1 %v27_v22 }
  0x2c   :  { %440 = vmatprep.mubr.msk.f32.mxu1 %vm496_vm0, %v495_v0 }
  0x2d   :  { %408 = vmatmul.mubr.f32.gmra.mxu0 %v17_v23 }
  0x2e   :  { %410 = vmatprep.mubr.msk.f32.mxu0 %vm496_vm0, %v495_v0 }
  0x2f   :  { %441 = vmatmul.mubr.f32.gmra.mxu1 %v28_v24 }
  0x30   :  { %443 = vmatprep.mubr.msk.f32.mxu1 %vm496_vm0, %v495_v0 }
  0x31   :  { %411 = vmatmul.mubr.f32.gmra.mxu0 %v18_v25 }
  0x32   :  { %413 = vmatprep.mubr.msk.f32.mxu0 %vm496_vm0, %v495_v0 }
  0x33   :  { %444 = vmatmul.mubr.f32.gmra.mxu1 %v29_v26 }
  0x34   :  { %446 = vmatprep.mubr.msk.f32.mxu1 %vm496_vm0, %v495_v0 }
  0x35   :  { %414 = vmatmul.mubr.f32.gmra.mxu0 %v19_v27 }
  0x36   :  { %416 = vmatprep.mubr.msk.f32.mxu0 %vm496_vm0, %v495_v0 }
  0x37   :  { %447 = vmatmul.mubr.f32.gmra.mxu1 %v30_v28 }
  0x38   :  { %449 = vmatprep.mubr.msk.f32.mxu1 %vm496_vm0, %v495_v0 }
  0x39   :  { %417 = vmatmul.mubr.f32.gmra.mxu0 %v20_v29 }
  0x3a   :  { %419 = vmatprep.mubr.msk.f32.mxu0 %vm496_vm0, %v495_v0 }
  0x3b   :  { %450 = vmatmul.mubr.f32.gmra.mxu1 %v31_v30 }
  0x3c   :  { %452 = vmatprep.mubr.msk.f32.mxu1 %vm496_vm0, %v495_v0 }
  0x3d   :  { %420 = vmatmul.mubr.f32.gmra.mxu0 %v21_v31 }
  0x3e   :  { %422 = vmatprep.mubr.msk.f32.mxu0 %vm496_vm0, %v495_v0 }
  0x3f   :  { %453 = vmatmul.mubr.f32.gmra.mxu1 %v32_v32 }
  0x40   :  { %455 = vmatprep.mubr.msk.f32.mxu1 %vm496_vm0, %v495_v0 }
  0x41   :  { %423 = vmatmul.mubr.f32.gmra.mxu0 %v22_v33 }
  0x42   :  { %425 = vmatprep.mubr.msk.f32.mxu0 %vm496_vm0, %v495_v0 }
  0x43   :  { %456 = vmatmul.mubr.f32.gmra.mxu1 %v33_v34 }
  0x44   :  { %458 = vmatprep.mubr.msk.f32.mxu1 %vm496_vm0, %v495_v0 }
  0x45   :  { %426 = vmatmul.mubr.f32.gmra.mxu0 %v23_v35 }
  0x46   :  { %428 = vmatprep.mubr.msk.f32.mxu0 %vm496_vm0, %v495_v0 }
  0x47   :  { %459 = vmatmul.mubr.f32.gmra.mxu1 %v34_v36 }
  0x49   :  { %429 = vmatmul.mubr.f32.gmra.mxu0 %v24_v37 }
  0xe1   :  { %v117_v38 = vpop.f32.mrf.mxu0 }
  0xe2   :  { %221 = vst [vmem:[%s820_s2] sm:$0xff] %v117_v38  ;;  %v269_v62 = vmul.f32 %v117_v38, %v117_v38 }
  0xe3   :  { %v400_v39 = vpop.f32.mrf.mxu0  ;;  %v710_v40 = vpop.f32.mrf.mxu1 }
  0xe4   :  { %232 = vst [vmem:[%s820_s2 + $0x58] sm:$0xff] %v710_v40 }
  0xe5   :  { %v122_v41 = vpop.f32.mrf.mxu0  ;;  %v433_v42 = vpop.f32.mrf.mxu1 }
  0xe6   :  { %222 = vst [vmem:[%s820_s2 + $0x8] sm:$0xff] %v122_v41  ;;  %v270_v59 = vmul.f32 %v122_v41, %v122_v41  ;;  %v242_v63 = vadd.f32 %v122_v41, %v117_v38 }
  0xe7   :  { %v403_v43 = vpop.f32.mrf.mxu0  ;;  %v719_v44 = vpop.f32.mrf.mxu1 }
  0xe8   :  { %233 = vst [vmem:[%s820_s2 + $0x60] sm:$0xff] %v719_v44  ;;  %v290_v3 = vadd.f32 %v270_v59, %v269_v62 }
  0xe9   :  { %v127_v45 = vpop.f32.mrf.mxu0  ;;  %v436_v46 = vpop.f32.mrf.mxu1 }
  0xea   :  { %223 = vst [vmem:[%s820_s2 + $0x10] sm:$0xff] %v127_v45  ;;  %v271_v0 = vmul.f32 %v127_v45, %v127_v45  ;;  %v243_v4 = vadd.f32 %v242_v63, %v127_v45 }
  0xeb   :  { %v406_v47 = vpop.f32.mrf.mxu0  ;;  %v728_v48 = vpop.f32.mrf.mxu1 }
  0xec   :  { %234 = vst [vmem:[%s820_s2 + $0x68] sm:$0xff] %v728_v48  ;;  %v291_v8 = vadd.f32 %v290_v3, %v271_v0 }
  0xed   :  { %v132_v49 = vpop.f32.mrf.mxu0  ;;  %v439_v50 = vpop.f32.mrf.mxu1 }
  0xee   :  { %224 = vst [vmem:[%s820_s2 + $0x18] sm:$0xff] %v132_v49  ;;  %v272_v5 = vmul.f32 %v132_v49, %v132_v49  ;;  %v244_v9 = vadd.f32 %v243_v4, %v132_v49  ;;  %v280_v49 = vmul.f32 %v710_v40, %v710_v40 }
  0xef   :  { %v409_v51 = vpop.f32.mrf.mxu0  ;;  %v737_v52 = vpop.f32.mrf.mxu1 }
  0xf0   :  { %235 = vst [vmem:[%s820_s2 + $0x70] sm:$0xff] %v737_v52  ;;  %v292_v13 = vadd.f32 %v291_v8, %v272_v5 }
  0xf1   :  { %v137_v53 = vpop.f32.mrf.mxu0  ;;  %v442_v54 = vpop.f32.mrf.mxu1 }
  0xf2   :  { %225 = vst [vmem:[%s820_s2 + $0x20] sm:$0xff] %v137_v53  ;;  %v273_v10 = vmul.f32 %v137_v53, %v137_v53  ;;  %v245_v14 = vadd.f32 %v244_v9, %v137_v53  ;;  %v281_v53 = vmul.f32 %v719_v44, %v719_v44 }
  0xf3   :  { %v412_v55 = vpop.f32.mrf.mxu0  ;;  %v746_v56 = vpop.f32.mrf.mxu1 }
  0xf4   :  { %236 = vst [vmem:[%s820_s2 + $0x78] sm:$0xff] %v746_v56  ;;  %v293_v18 = vadd.f32 %v292_v13, %v273_v10 }
  0xf5   :  { %v142_v57 = vpop.f32.mrf.mxu0  ;;  %v445_v58 = vpop.f32.mrf.mxu1 }
  0xf6   :  { %226 = vst [vmem:[%s820_s2 + $0x28] sm:$0xff] %v142_v57  ;;  %v274_v15 = vmul.f32 %v142_v57, %v142_v57  ;;  %v246_v19 = vadd.f32 %v245_v14, %v142_v57  ;;  %v282_v57 = vmul.f32 %v728_v48, %v728_v48 }
  0xf7   :  { %v415_v60 = vpop.f32.mrf.mxu0  ;;  %v755_v61 = vpop.f32.mrf.mxu1 }
  0xf8   :  { %237 = vst [vmem:[%s820_s2 + $0x80] sm:$0xff] %v755_v61  ;;  %v294_v23 = vadd.f32 %v293_v18, %v274_v15  ;;  %v283_v60 = vmul.f32 %v737_v52, %v737_v52 }
  0xf9   :  { %v147_v1 = vpop.f32.mrf.mxu0  ;;  %v448_v2 = vpop.f32.mrf.mxu1 }
  0xfa   :  { %227 = vst [vmem:[%s820_s2 + $0x30] sm:$0xff] %v147_v1  ;;  %v275_v20 = vmul.f32 %v147_v1, %v147_v1  ;;  %v247_v24 = vadd.f32 %v246_v19, %v147_v1  ;;  %v285_v2 = vmul.f32 %v755_v61, %v755_v61 }
  0xfb   :  { %v418_v6 = vpop.f32.mrf.mxu0  ;;  %v764_v7 = vpop.f32.mrf.mxu1 }
  0xfc   :  { %238 = vst [vmem:[%s820_s2 + $0x88] sm:$0xff] %v764_v7  ;;  %v295_v28 = vadd.f32 %v294_v23, %v275_v20  ;;  %v286_v5 = vmul.f32 %v764_v7, %v764_v7 }
  0xfd   :  { %v152_v11 = vpop.f32.mrf.mxu0  ;;  %v451_v12 = vpop.f32.mrf.mxu1 }
  0xfe   :  { %228 = vst [vmem:[%s820_s2 + $0x38] sm:$0xff] %v152_v11  ;;  %v276_v25 = vmul.f32 %v152_v11, %v152_v11  ;;  %v248_v29 = vadd.f32 %v247_v24, %v152_v11 }
  0xff   :  { %v421_v16 = vpop.f32.mrf.mxu0  ;;  %v207_v17 = vpop.f32.mrf.mxu1 }
 0x100   :  { %239 = vst [vmem:[%s820_s2 + $0x90] sm:$0xff] %v207_v17  ;;  %v296_v33 = vadd.f32 %v295_v28, %v276_v25  ;;  %v287_v8 = vmul.f32 %v207_v17, %v207_v17 }
 0x101   :  { %v157_v21 = vpop.f32.mrf.mxu0  ;;  %v454_v22 = vpop.f32.mrf.mxu1 }
 0x102   :  { %229 = vst [vmem:[%s820_s2 + $0x40] sm:$0xff] %v157_v21  ;;  %v277_v30 = vmul.f32 %v157_v21, %v157_v21  ;;  %v249_v34 = vadd.f32 %v248_v29, %v157_v21 }
 0x103   :  { %v424_v26 = vpop.f32.mrf.mxu0  ;;  %v212_v27 = vpop.f32.mrf.mxu1 }
 0x104   :  { %240 = vst [vmem:[%s820_s2 + $0x98] sm:$0xff] %v212_v27  ;;  %v297_v38 = vadd.f32 %v296_v33, %v277_v30  ;;  %v288_v11 = vmul.f32 %v212_v27, %v212_v27 }
 0x105   :  { %v162_v31 = vpop.f32.mrf.mxu0  ;;  %v457_v32 = vpop.f32.mrf.mxu1 }
 0x106   :  { %230 = vst [vmem:[%s820_s2 + $0x48] sm:$0xff] %v162_v31  ;;  %v278_v35 = vmul.f32 %v162_v31, %v162_v31  ;;  %v250_v39 = vadd.f32 %v249_v34, %v162_v31 }
 0x107   :  { %v427_v36 = vpop.f32.mrf.mxu0  ;;  %v217_v37 = vpop.f32.mrf.mxu1 }
 0x108   :  { %241 = vst [vmem:[%s820_s2 + $0xa0] sm:$0xff] %v217_v37  ;;  %v298_v43 = vadd.f32 %v297_v38, %v278_v35 }
 0x109   :  { %v167_v41 = vpop.f32.mrf.mxu0  ;;  %v460_v42 = vpop.f32.mrf.mxu1 }
 0x10a   :  { %231 = vst [vmem:[%s820_s2 + $0x50] sm:$0xff] %v167_v41  ;;  %v251_v45 = vadd.f32 %v250_v39, %v167_v41  ;;  %v279_v46 = vmul.f32 %v167_v41, %v167_v41 }
 0x10b   :  { %v430_v47 = vpop.f32.mrf.mxu0 }
 0x10c   :  { %v252_v50 = vadd.f32 %v251_v45, %v710_v40  ;;  %v299_v51 = vadd.f32 %v298_v43, %v279_v46  ;;  %v284_v40 = vmul.f32 %v746_v56, %v746_v56 }
 0x10e   :  { %v253_v54 = vadd.f32 %v252_v50, %v719_v44  ;;  %v300_v55 = vadd.f32 %v299_v51, %v280_v49 }
 0x110   :  { %v301_v58 = vadd.f32 %v300_v55, %v281_v53  ;;  %v254_v59 = vadd.f32 %v253_v54, %v728_v48 }
 0x112   :  { %v255_v62 = vadd.f32 %v254_v59, %v737_v52  ;;  %v302_v63 = vadd.f32 %v301_v58, %v282_v57 }
 0x114   :  { %v256_v0 = vadd.f32 %v255_v62, %v746_v56  ;;  %v303_v1 = vadd.f32 %v302_v63, %v283_v60  ;;  %v289_v56 = vmul.f32 %v217_v37, %v217_v37 }
 0x116   :  { %v257_v44 = vadd.f32 %v256_v0, %v755_v61  ;;  %v304_v3 = vadd.f32 %v303_v1, %v284_v40 }
 0x118   :  { %v305_v4 = vadd.f32 %v304_v3, %v285_v2  ;;  %v258_v48 = vadd.f32 %v257_v44, %v764_v7 }
 0x11a   :  { %v306_v52 = vadd.f32 %v305_v4, %v286_v5  ;;  %v259_v6 = vadd.f32 %v258_v48, %v207_v17 }
 0x11c   :  { %v307_v9 = vadd.f32 %v306_v52, %v287_v8  ;;  %v260_v10 = vadd.f32 %v259_v6, %v212_v27 }
 0x11e   :  { %v308_v12 = vadd.f32 %v307_v9, %v288_v11  ;;  %v261_v13 = vadd.f32 %v260_v10, %v217_v37 }
 0x120   :  { %v262_v14 = vrot.slane %v261_v13, 4  ;;  %v309_v15 = vadd.f32 %v308_v12, %v289_v56 }
 0x122   :  { %v263_v16 = vadd.f32 %v262_v14, %v261_v13  ;;  %v310_v61 = vrot.slane %v309_v15, 4 }
 0x124   :  { %v264_v18 = vrot.slane %v263_v16, 2  ;;  %v311_v19 = vadd.f32 %v310_v61, %v309_v15 }
 0x126   :  { %v265_v20 = vadd.f32 %v264_v18, %v263_v16  ;;  %v312_v21 = vrot.slane %v311_v19, 2 }
 0x128   :  { %v266_v22 = vrot.slane %v265_v20, 1  ;;  %v313_v23 = vadd.f32 %v312_v21, %v311_v19 }
 0x12a   :  { %v267_v7 = vadd.f32 %v266_v22, %v265_v20  ;;  %v314_v24 = vrot.slane %v313_v23, 1 }
 0x12c   :  { %268 = vst [vmem:[%s821_s3] sm:$0x1] %v267_v7  ;;  %v315_v17 = vadd.f32 %v314_v24, %v313_v23 }
 0x12e   :  { %316 = vst [vmem:[%s822_s4] sm:$0x1] %v315_v17 }

</bundles_post_ra>
